<compile_context>
chip_gen: v5e
topology: v5e:2x2
jax: 0.10.0
libtpu: 0.0.40
codegen_flags: <defaults>
</compile_context>

<pallas_src>
import jax
import jax.numpy as jnp
from jax.experimental import pallas as pl
from jax.experimental.pallas import tpu as pltpu

OBS_DIM = 17
ACT_DIM = 6
HIDDEN = 256          # arch='256-256'
_TB_CAP = 2048        # per-tile batch cap (VMEM is nowhere near binding at this size)


def _num_tensorcores():
    """Best-effort TensorCore count of device 0 (v7x has 2, v5e/v6e have 1)."""
    try:
        dev = jax.devices()[0]
        if getattr(dev, "platform", "") != "tpu":
            return 1
        n = getattr(dev, "num_cores", None)
        if isinstance(n, int) and n >= 1:
            return min(int(n), 2)
        return 2 if "v7" in str(getattr(dev, "device_kind", "")).lower() else 1
    except Exception:
        return 1


_NUM_CORES = _num_tensorcores()


def _q_mlp_kernel(x_ref, w1_ref, w2_ref, b2_ref, w3_ref, b3_ref, o_ref):
    """Fused 3-layer MLP for one batch tile, feature-major layout.

    x_ref : (D+1, TB) f32   stacked [obs; act; ones] columns (ones row folds in b1)
    w1_ref: (H, D+1)  f32   layer-1 weight with bias column appended
    w2_ref: (H, H)    f32
    b2_ref: (H, 1)    f32
    w3_ref: (1, H)    f32
    b3_ref: (1, 1)    f32   (SMEM scalar)
    o_ref : (1, TB)   f32   lane-dense q row for this tile
    """
    # layer 1 (bias folded into the matmul via the ones row)
    h = jnp.dot(w1_ref[...], x_ref[...], preferred_element_type=jnp.float32)
    h = jnp.maximum(h, 0.0)

    # layer 2: (H, H) @ (H, TB); single fused bias+ReLU epilogue
    h2 = jnp.dot(w2_ref[...], h, preferred_element_type=jnp.float32)
    h2 = jnp.maximum(h2 + b2_ref[...], 0.0)

    # layer 3 (256 -> 1) on the MXU: (1, H) @ (H, TB) -> (1, TB)
    q = jnp.dot(w3_ref[...], h2, preferred_element_type=jnp.float32) + b3_ref[0, 0]
    o_ref[...] = q


def _choose_tb(n_rows, num_cores):
    """Batch tile: multiple of 128; one big tile on 1-TC chips, ~2 tiles on 2-TC chips."""
    n128 = ((n_rows + 127) // 128) * 128
    if num_cores >= 2 and n128 >= 256:
        tb = -(-n128 // (2 * 128)) * 128      # ~half the padded batch, 128-aligned
    else:
        tb = n128
    return max(128, min(_TB_CAP, tb))


def _q_mlp(x_t, w1c, w2t, b2c, w3r, b3s, tb):
    """x_t: (D+1, N_pad) f32 stacked inputs. Returns (1, N_pad) f32 q-values."""
    d1, n_pad = x_t.shape
    hidden = w2t.shape[0]
    assert n_pad % tb == 0
    return pl.pallas_call(
        _q_mlp_kernel,
        out_shape=jax.ShapeDtypeStruct((1, n_pad), jnp.float32),
        grid_spec=pltpu.PrefetchScalarGridSpec(
            num_scalar_prefetch=0,
            grid=(n_pad // tb,),
            in_specs=[
                pl.BlockSpec((d1, tb), lambda i: (0, i)),
                pl.BlockSpec((hidden, d1), lambda i: (0, 0)),
                pl.BlockSpec((hidden, hidden), lambda i: (0, 0)),
                pl.BlockSpec((hidden, 1), lambda i: (0, 0)),
                pl.BlockSpec((1, hidden), lambda i: (0, 0)),
                pl.BlockSpec(memory_space=pltpu.MemorySpace.SMEM),
            ],
            out_specs=pl.BlockSpec((1, tb), lambda i: (0, i)),
        ),
        compiler_params=pltpu.CompilerParams(
            dimension_semantics=("parallel",)),
    )(x_t, w1c, w2t, b2c, w3r, b3s)


def prepare_kernel_params(params):
    """One-time re-layout of the PyTorch-style params (x @ W + b convention) into
    kernel layout. Hoisted out of the forward path so the per-call wrapper only
    does input prep + the Pallas call."""
    w1, b1, w2, b2, w3, b3 = params
    hidden = w2.shape[0]
    # layer-1 weight transposed with bias folded in as the last column: (H, D+1)
    w1c = jnp.concatenate(
        [w1.T.astype(jnp.float32), b1.reshape(hidden, 1).astype(jnp.float32)], axis=1)
    w2t = w2.T.astype(jnp.float32)                    # (H, H)
    b2c = b2.reshape(hidden, 1).astype(jnp.float32)   # (H, 1)
    w3r = w3.reshape(1, hidden).astype(jnp.float32)   # (1, H)
    b3s = b3.reshape(1, 1).astype(jnp.float32)        # (1, 1) -> SMEM scalar
    return (w1c, w2t, b2c, w3r, b3s)


def fully_connected_q_forward(kparams, observations, actions):
    """Mirrors FullyConnectedQFunction.forward (is_x_grad=False) including the
    @multiple_action_q_function wrapper semantics. `kparams` comes from
    prepare_kernel_params()."""
    # TODO(synk): is_x_grad=True branch (autograd.grad wrt input + norm) not implemented.
    w1c, w2t, b2c, w3r, b3s = kparams

    multiple_actions = False
    batch_size = observations.shape[0]
    if actions.ndim == 3 and observations.ndim == 2:
        multiple_actions = True
        repeat = actions.shape[1]
        obs_dim_in = observations.shape[-1]
        observations = jnp.broadcast_to(
            observations[:, None, :], (batch_size, repeat, obs_dim_in)
        ).reshape(-1, obs_dim_in)
        actions = actions.reshape(-1, actions.shape[-1])

    n = observations.shape[0]
    tb = _choose_tb(n, _NUM_CORES)
    n_pad = -(-n // tb) * tb

    # Single fused prep per call: concat(obs, act, ones) -> f32 -> transpose -> pad.
    # The ones row carries the layer-1 bias; zero-padded batch columns therefore get
    # no bias and are simply sliced off after the kernel.
    x = jnp.concatenate(
        [observations.astype(jnp.float32),
         actions.astype(jnp.float32),
         jnp.ones((n, 1), jnp.float32)], axis=-1)          # (n, D+1)
    x_t = jnp.pad(x.T, ((0, 0), (0, n_pad - n)))           # (D+1, n_pad), feature-major

    q = _q_mlp(x_t, w1c, w2t, b2c, w3r, b3s, tb)[0, :n]
    if multiple_actions:
        q = q.reshape(batch_size, -1)
    return q


def init_params(key, obs_dim, act_dim, hidden):
    """Deterministic parameter init (PyTorch-default-style uniform for hidden layers,
    xavier_uniform(gain=0.01) + zero bias for the last layer). Stored as x @ W + b."""
    d_in = obs_dim + act_dim
    k1, k2, k3, k4, k5 = jax.random.split(key, 5)

    def lin_init(kw, kb, fan_in, fan_out):
        bound = 1.0 / jnp.sqrt(fan_in)
        w = jax.random.uniform(kw, (fan_in, fan_out), jnp.float32, -bound, bound)
        b = jax.random.uniform(kb, (1, fan_out), jnp.float32, -bound, bound)
        return w, b

    w1, b1 = lin_init(k1, k2, d_in, hidden)
    w2, b2 = lin_init(k3, k4, hidden, hidden)
    # last_fc: xavier_uniform(gain=0.01), bias = 0
    limit = 0.01 * jnp.sqrt(6.0 / (hidden + 1))
    w3 = jax.random.uniform(k5, (hidden, 1), jnp.float32, -limit, limit)
    b3 = jnp.zeros((1, 1), jnp.float32)
    return (w1, b1, w2, b2, w3, b3)


def reference_forward(params, observations, actions):
    """Plain-JAX (f32) reference for correctness checking."""
    w1, b1, w2, b2, w3, b3 = params
    batch_size = observations.shape[0]
    multiple_actions = actions.ndim == 3 and observations.ndim == 2
    if multiple_actions:
        repeat = actions.shape[1]
        obs = jnp.broadcast_to(
            observations[:, None, :],
            (batch_size, repeat, observations.shape[-1])).reshape(-1, observations.shape[-1])
        act = actions.reshape(-1, actions.shape[-1])
    else:
        obs, act = observations, actions
    x = jnp.concatenate([obs, act], axis=-1)
    h = jnp.maximum(x @ w1 + b1, 0.0)
    h = jnp.maximum(h @ w2 + b2, 0.0)
    q = (h @ w3 + b3)[:, 0]
    if multiple_actions:
        q = q.reshape(batch_size, -1)
    return q


if __name__ == "__main__":
    key = jax.random.PRNGKey(0)
    kp, ko, ka, ka2, ko2, ka3 = jax.random.split(key, 6)

    params = init_params(kp, OBS_DIM, ACT_DIM, HIDDEN)
    kparams = prepare_kernel_params(params)          # weight re-layout hoisted (done once)
    fwd = jax.jit(fully_connected_q_forward)

    # multiple-actions case: observations [B, obs_dim], actions [B, R, act_dim]
    B, R = 2, 8
    observations = jax.random.normal(ko, (B, OBS_DIM), jnp.float32)
    actions_multi = jax.random.normal(ka, (B, R, ACT_DIM), jnp.float32)
    # single-action case: actions [B, act_dim]
    actions_single = jax.random.normal(ka2, (B, ACT_DIM), jnp.float32)
    # larger case exercising batch padding (and a multi-tile grid on 2-TC chips)
    B2, R2 = 200, 3
    observations2 = jax.random.normal(ko2, (B2, OBS_DIM), jnp.float32)
    actions_big = jax.random.normal(ka3, (B2, R2, ACT_DIM), jnp.float32)

    q_multi = fwd(kparams, observations, actions_multi)
    q_single = fwd(kparams, observations, actions_single)
    q_big = fwd(kparams, observations2, actions_big)
    jax.block_until_ready((q_multi, q_single, q_big))

    ref_multi = reference_forward(params, observations, actions_multi)
    ref_single = reference_forward(params, observations, actions_single)
    ref_big = reference_forward(params, observations2, actions_big)

    assert q_multi.shape == (B, R), q_multi.shape
    assert q_single.shape == (B,), q_single.shape
    assert q_big.shape == (B2, R2), q_big.shape
    # f32 end-to-end (MXU default precision) -> tight-ish tolerances
    assert jnp.allclose(q_multi, ref_multi, atol=2e-3, rtol=1e-2)
    assert jnp.allclose(q_single, ref_single, atol=2e-3, rtol=1e-2)
    assert jnp.allclose(q_big, ref_big, atol=2e-3, rtol=1e-2)

    print("KERNEL_OK")
</pallas_src>

<mosaic_0001>
module attributes {stable_mosaic.version = 11 : i64} {
  func.func @_q_mlp_kernel(%arg0: i32, %arg1: memref<24x128xf32, #tpu.memory_space<vmem>>, %arg2: memref<256x24xf32, #tpu.memory_space<vmem>>, %arg3: memref<256x256xf32, #tpu.memory_space<vmem>>, %arg4: memref<256x1xf32, #tpu.memory_space<vmem>>, %arg5: memref<1x256xf32, #tpu.memory_space<vmem>>, %arg6: memref<1x1xf32, #tpu.memory_space<smem>>, %arg7: memref<1x128xf32, #tpu.memory_space<vmem>>) attributes {dimension_semantics = [#tpu.dimension_semantics<parallel>], iteration_bounds = array<i64: 1>, scalar_prefetch = 0 : i64, scratch_operands = 0 : i64, tpu.core_type = #tpu.core_type<tc>, window_params = [{transform_indices = @transform_0, window_bounds = array<i64: 24, 128>}, {pipeline_mode = #tpu.pipeline_mode<synchronous>, transform_indices = @transform_1, window_bounds = array<i64: 256, 24>}, {pipeline_mode = #tpu.pipeline_mode<synchronous>, transform_indices = @transform_2, window_bounds = array<i64: 256, 256>}, {pipeline_mode = #tpu.pipeline_mode<synchronous>, transform_indices = @transform_3, window_bounds = array<i64: 256, 1>}, {pipeline_mode = #tpu.pipeline_mode<synchronous>, transform_indices = @transform_4, window_bounds = array<i64: 1, 256>}, {transform_indices = @transform_5, window_bounds = array<i64: 1, 1>}, {transform_indices = @transform_6, window_bounds = array<i64: 1, 128>}]} {
    %c0 = arith.constant 0 : index
    %c0_0 = arith.constant 0 : index
    %0 = vector.load %arg2[%c0, %c0_0] : memref<256x24xf32, #tpu.memory_space<vmem>>, vector<256x24xf32>
    %c0_1 = arith.constant 0 : index
    %c0_2 = arith.constant 0 : index
    %1 = vector.load %arg1[%c0_1, %c0_2] : memref<24x128xf32, #tpu.memory_space<vmem>>, vector<24x128xf32>
    %cst = arith.constant dense<0.000000e+00> : vector<256x128xf32>
    %2 = tpu.matmul %0, %1, %cst {dimension_numbers = #tpu.dot_dimension_numbers<[1], [0], [0], [1], [0, 0, 1, 1], [], []>} : vector<256x24xf32>, vector<24x128xf32>, vector<256x128xf32> -> vector<256x128xf32>
    %cst_3 = arith.constant 0.000000e+00 : f32
    %3 = vector.broadcast %cst_3 : f32 to vector<256x128xf32>
    %4 = arith.maximumf %2, %3 : vector<256x128xf32>
    %c0_4 = arith.constant 0 : index
    %c0_5 = arith.constant 0 : index
    %5 = vector.load %arg3[%c0_4, %c0_5] : memref<256x256xf32, #tpu.memory_space<vmem>>, vector<256x256xf32>
    %cst_6 = arith.constant dense<0.000000e+00> : vector<256x128xf32>
    %6 = tpu.matmul %5, %4, %cst_6 {dimension_numbers = #tpu.dot_dimension_numbers<[1], [0], [0], [1], [0, 0, 1, 1], [], []>} : vector<256x256xf32>, vector<256x128xf32>, vector<256x128xf32> -> vector<256x128xf32>
    %c0_7 = arith.constant 0 : index
    %c0_8 = arith.constant 0 : index
    %7 = vector.load %arg4[%c0_7, %c0_8] : memref<256x1xf32, #tpu.memory_space<vmem>>, vector<256x1xf32>
    %8 = vector.broadcast %7 : vector<256x1xf32> to vector<256x128xf32>
    %9 = arith.addf %6, %8 : vector<256x128xf32>
    %cst_9 = arith.constant 0.000000e+00 : f32
    %10 = vector.broadcast %cst_9 : f32 to vector<256x128xf32>
    %11 = arith.maximumf %9, %10 : vector<256x128xf32>
    %c0_10 = arith.constant 0 : index
    %c0_11 = arith.constant 0 : index
    %12 = vector.load %arg5[%c0_10, %c0_11] : memref<1x256xf32, #tpu.memory_space<vmem>>, vector<1x256xf32>
    %cst_12 = arith.constant dense<0.000000e+00> : vector<1x128xf32>
    %13 = tpu.matmul %12, %11, %cst_12 {dimension_numbers = #tpu.dot_dimension_numbers<[1], [0], [0], [1], [0, 0, 1, 1], [], []>} : vector<1x256xf32>, vector<256x128xf32>, vector<1x128xf32> -> vector<1x128xf32>
    %c0_13 = arith.constant 0 : index
    %c0_14 = arith.constant 0 : index
    %14 = memref.load %arg6[%c0_13, %c0_14] : memref<1x1xf32, #tpu.memory_space<smem>>
    %15 = vector.broadcast %14 : f32 to vector<1x128xf32>
    %16 = arith.addf %13, %15 : vector<1x128xf32>
    %c0_15 = arith.constant 0 : index
    %c0_16 = arith.constant 0 : index
    %17 = vector.load %arg7[%c0_15, %c0_16] : memref<1x128xf32, #tpu.memory_space<vmem>>, vector<1x128xf32>
    tpu.vector_store %arg7[%c0_15, %c0_16], %16 {strides = array<i32>} : memref<1x128xf32, #tpu.memory_space<vmem>>, vector<1x128xf32>,
    return
  }
  func.func @transform_0(%arg0: i32) -> (i32, i32) {
    %c0_i32 = arith.constant 0 : i32
    %c0_i32_0 = arith.constant 0 : i32
    return %c0_i32, %arg0 : i32, i32
  }
  func.func @transform_1(%arg0: i32) -> (i32, i32) {
    %c0_i32 = arith.constant 0 : i32
    %c0_i32_0 = arith.constant 0 : i32
    %c0_i32_1 = arith.constant 0 : i32
    return %c0_i32, %c0_i32_0 : i32, i32
  }
  func.func @transform_2(%arg0: i32) -> (i32, i32) {
    %c0_i32 = arith.constant 0 : i32
    %c0_i32_0 = arith.constant 0 : i32
    %c0_i32_1 = arith.constant 0 : i32
    return %c0_i32, %c0_i32_0 : i32, i32
  }
  func.func @transform_3(%arg0: i32) -> (i32, i32) {
    %c0_i32 = arith.constant 0 : i32
    %c0_i32_0 = arith.constant 0 : i32
    %c0_i32_1 = arith.constant 0 : i32
    return %c0_i32, %c0_i32_0 : i32, i32
  }
  func.func @transform_4(%arg0: i32) -> (i32, i32) {
    %c0_i32 = arith.constant 0 : i32
    %c0_i32_0 = arith.constant 0 : i32
    %c0_i32_1 = arith.constant 0 : i32
    return %c0_i32, %c0_i32_0 : i32, i32
  }
  func.func @transform_5(%arg0: i32) -> (i32, i32) {
    %c0_i32 = arith.constant 0 : i32
    %c0_i32_0 = arith.constant 0 : i32
    %c0_i32_1 = arith.constant 0 : i32
    return %c0_i32, %c0_i32_0 : i32, i32
  }
  func.func @transform_6(%arg0: i32) -> (i32, i32) {
    %c0_i32 = arith.constant 0 : i32
    %c0_i32_0 = arith.constant 0 : i32
    return %c0_i32, %arg0 : i32, i32
  }
}

</mosaic_0001>

<bundles_post_ra>
// kernel: squeeze.1
= control target key start
LH: loop header
LB: loop body
LE: loop exit
PB: predicated region body
PF: predicated region fallthrough
CT: control target
= control target key end

     0   :  { %s80_s0 = inlined_call_operand.vmem [shape: f32[16], index: 0, kind: input, shape index: {}]   ;;  %s81_s1 = inlined_call_operand.hbm [shape: f32[2,8], index: 1, kind: output, shape index: {}]  }
   0x1   :  { %v5_v0 = vld [vmem:[%s80_s0] sm:$0x1] }
   0x2   :  { %2 = vsyncpa [#allocation1], 0  ;;  %6 = vst [vmem:[#allocation3] sm:$0x1] %v5_v0  ;;  %vm8_vm0 = vcmask 64512   ;;  %s62_s0 = smov 120  }
   0x3   :  { %s63_s8 = smov [#allocation0]   ;;  %s27_s1 = sshll.u32 %s81_s1, 4  ;;  %s28_s1 = int_to_ptr.hbm [resolvable:$true] %s27_s1 }
   0x4   :  { %s25_s9 = sshll.u32 %s63_s8, 4  ;;  %s26_s9 = int_to_ptr.vmem [resolvable:$true] %s25_s9 }
   0x9   :  { %v10_v1 = vld [vmem:[#allocation3] sm:$0x1]  }
   0xa   :  { %v7_v2 = vld [vmem:[#allocation3] sm:$0x1]   ;;  %11 = vrot.lane.b32.xlu0 %v10_v1, %s62_s0 }
   0xb   :  { %9 = vst.msk [vmem:[#allocation2] sm:$0x1] %vm8_vm0, %v7_v2  }
  0x7c   :  { %v12_v3 = vpop.permute.xlu0 %11  }
  0x7d   :  { %15 = vst.msk [vmem:[#allocation2 + $0x1] sm:$0x1] %vm8_vm0, %v12_v3  }
  0x84   :  { %v18_v4 = vld [vmem:[#allocation2] sm:$0x3] }
  0x85   :  { %21 = vst [vmem:[#allocation0] sm:$0x3] %v18_v4 }
  0x86   :  { %30 = dma.vmem_to_hbm [thread:$0]  %s26_s9, 32, %s28_s1, [#allocation1]  }
  0x87   :  { %60 = dma.done.wait [#allocation1], 32  }
  0x88   :  { %61 = vsyncadd [#allocation1], 4294967264 }
  0x89   :  { %33 = vsyncpa [#allocation1], 1 }

// kernel: fully_connected_q_forward.1
= control target key start
LH: loop header
LB: loop body
LE: loop exit
PB: predicated region body
PF: predicated region fallthrough
CT: control target
= control target key end

     0   :  { %vm59_vm0 = vcmask 195584   ;;  %s1607_s0 = inlined_call_operand.vmem [shape: f32[24,128], index: 0, kind: input, shape index: {}]   ;;  %s1608_s1 = inlined_call_operand.vmem [shape: f32[256,24], index: 1, kind: input, shape index: {}]   ;;  %s1609_s2 = inlined_call_operand.vmem [shape: f32[256,256], index: 2, kind: input, shape index: {}]   ;;  %s1610_s3 = inlined_call_operand.vmem [shape: f32[256,1], index: 3, kind: input, shape index: {}]   ;;  %s1611_s4 = inlined_call_operand.vmem [shape: f32[1,256], index: 4, kind: input, shape index: {}]   ;;  %s1612_s5 = inlined_call_operand.<no memory space> [shape: f32[1,1], index: 5, kind: input, shape index: {}]   ;;  %s1613_s6 = inlined_call_operand.vmem [shape: f32[1,128], index: 6, kind: output, shape index: {}]  }
   0x1   :  { %v58_v0 = vld [vmem:[%s1607_s0 + $0x10] sm:$0xff]  ;;  %v57_v1 = vld [vmem:[%s1607_s0 + $0x8] sm:$0xff]  ;;  %v56_v2 = vld [vmem:[%s1607_s0] sm:$0xff] }
   0x2   :  { %169 = vmatpush.msra.mxu0 %v58_v0  ;;  %900 = vmatpush.msra.mxu3 %v58_v0  ;;  %v24_v3 = vld [vmem:[%s1608_s1] sm:$0xff]  ;;  %v25_v4 = vld [vmem:[%s1608_s1 + $0x8] sm:$0xff]  ;;  %v26_v5 = vld [vmem:[%s1608_s1 + $0x10] sm:$0xff] }
   0x3   :  { %v27_v6 = vld [vmem:[%s1608_s1 + $0x18] sm:$0xff]  ;;  %v28_v7 = vld [vmem:[%s1608_s1 + $0x20] sm:$0xff]  ;;  %v29_v8 = vld [vmem:[%s1608_s1 + $0x28] sm:$0xff] }
   0x4   :  { %170 = vmatpush.msra.mxu0 %v57_v1  ;;  %901 = vmatpush.msra.mxu3 %v57_v1  ;;  %v30_v9 = vld [vmem:[%s1608_s1 + $0x30] sm:$0xff]  ;;  %v31_v10 = vld [vmem:[%s1608_s1 + $0x38] sm:$0xff]  ;;  %v32_v11 = vld [vmem:[%s1608_s1 + $0x40] sm:$0xff] }
   0x5   :  { %v33_v12 = vld [vmem:[%s1608_s1 + $0x48] sm:$0xff]  ;;  %v34_v13 = vld [vmem:[%s1608_s1 + $0x50] sm:$0xff]  ;;  %v35_v14 = vld [vmem:[%s1608_s1 + $0x58] sm:$0xff] }
   0x6   :  { %171 = vmatpush.msra.mxu0 %v56_v2  ;;  %902 = vmatpush.msra.mxu3 %v56_v2  ;;  %v51_v15 = vld [vmem:[%s1608_s1 + $0xd8] sm:$0xff]  ;;  %v36_v16 = vld [vmem:[%s1608_s1 + $0x60] sm:$0xff]  ;;  %v37_v18 = vld [vmem:[%s1608_s1 + $0x68] sm:$0xff] }
   0x7   :  { %868 = vmatmul.msk.f32.vlgmr.msra.gmra.mxu0 %vm59_vm0, %v24_v3  ;;  %895 = vmatmul.msk.f32.vlgmr.msra.gmra.mxu3 %vm59_vm0, %v51_v15  ;;  %v52_v17 = vld [vmem:[%s1608_s1 + $0xe0] sm:$0xff]  ;;  %v53_v19 = vld [vmem:[%s1608_s1 + $0xe8] sm:$0xff]  ;;  %v38_v20 = vld [vmem:[%s1608_s1 + $0x70] sm:$0xff] }
   0x8   :  { %v54_v21 = vld [vmem:[%s1608_s1 + $0xf0] sm:$0xff]  ;;  %v39_v22 = vld [vmem:[%s1608_s1 + $0x78] sm:$0xff]  ;;  %v40_v25 = vld [vmem:[%s1608_s1 + $0x80] sm:$0xff] }
   0x9   :  { %v55_v23 = vld [vmem:[%s1608_s1 + $0xf8] sm:$0xff]  ;;  %v41_v27 = vld [vmem:[%s1608_s1 + $0x88] sm:$0xff]  ;;  %v42_v29 = vld [vmem:[%s1608_s1 + $0x90] sm:$0xff] }
   0xa   :  { %v43_v31 = vld [vmem:[%s1608_s1 + $0x98] sm:$0xff]  ;;  %v44_v33 = vld [vmem:[%s1608_s1 + $0xa0] sm:$0xff]  ;;  %v45_v35 = vld [vmem:[%s1608_s1 + $0xa8] sm:$0xff] }
   0xb   :  { %v46_v37 = vld [vmem:[%s1608_s1 + $0xb0] sm:$0xff]  ;;  %v47_v39 = vld [vmem:[%s1608_s1 + $0xb8] sm:$0xff]  ;;  %v48_v41 = vld [vmem:[%s1608_s1 + $0xc0] sm:$0xff] }
   0xc   :  { %v49_v43 = vld [vmem:[%s1608_s1 + $0xc8] sm:$0xff]  ;;  %v50_v45 = vld [vmem:[%s1608_s1 + $0xd0] sm:$0xff] }
   0xf   :  { %869 = vmatmul.msk.f32.gmra.mxu0 %vm59_vm0, %v25_v4  ;;  %896 = vmatmul.msk.f32.gmra.mxu3 %vm59_vm0, %v52_v17 }
  0x17   :  { %870 = vmatmul.msk.f32.gmra.mxu0 %vm59_vm0, %v26_v5  ;;  %897 = vmatmul.msk.f32.gmra.mxu3 %vm59_vm0, %v53_v19  ;;  %v939_v19 = vmov 0  }
  0x18   :  { %936 = vset.pattern.permute.xlu0 %v939_v19  ;;  %938 = vset.pattern.permute.xlu2 %v939_v19 }
  0x19   :  { %937 = vset.pattern.permute.xlu1 %v939_v19  ;;  %v361_v19 = vld [vmem:[%s1609_s2 + $0x1e0] sm:$0xff] }
  0x1f   :  { %871 = vmatmul.msk.f32.gmra.mxu0 %vm59_vm0, %v27_v6  ;;  %898 = vmatmul.msk.f32.gmra.mxu3 %vm59_vm0, %v54_v21 }
  0x27   :  { %872 = vmatmul.msk.f32.gmra.mxu0 %vm59_vm0, %v28_v7  ;;  %899 = vmatmul.msk.f32.gmra.mxu3 %vm59_vm0, %v55_v23  ;;  %v305_v23 = vld [vmem:[%s1609_s2 + $0x20] sm:$0xff] }
  0x2f   :  { %873 = vmatmul.msk.f32.gmra.mxu0 %vm59_vm0, %v29_v8 }
  0x37   :  { %874 = vmatmul.msk.f32.gmra.mxu0 %vm59_vm0, %v30_v9 }
  0x3f   :  { %875 = vmatmul.msk.f32.gmra.mxu0 %vm59_vm0, %v31_v10 }
  0x47   :  { %876 = vmatmul.msk.f32.gmra.mxu0 %vm59_vm0, %v32_v11 }
  0x4f   :  { %877 = vmatmul.msk.f32.gmra.mxu0 %vm59_vm0, %v33_v12 }
  0x57   :  { %878 = vmatmul.msk.f32.gmra.mxu0 %vm59_vm0, %v34_v13 }
  0x5f   :  { %879 = vmatmul.msk.f32.gmra.mxu0 %vm59_vm0, %v35_v14 }
  0x67   :  { %880 = vmatmul.msk.f32.gmra.mxu0 %vm59_vm0, %v36_v16  ;;  %v301_v16 = vld [vmem:[%s1609_s2] sm:$0xff] }
  0x6f   :  { %881 = vmatmul.msk.f32.gmra.mxu0 %vm59_vm0, %v37_v18  ;;  %v380_v18 = vld [vmem:[%s1610_s3 + $0x78] sm:$0xff] }
  0x70   :  { %474 = vperm.xlu0 %936, %v380_v18   ;;  %v325_v18 = vld [vmem:[%s1609_s2 + $0xc0] sm:$0xff] }
  0x77   :  { %882 = vmatmul.msk.f32.gmra.mxu0 %vm59_vm0, %v38_v20  ;;  %v303_v20 = vld [vmem:[%s1609_s2 + $0x10] sm:$0xff] }
  0x7f   :  { %883 = vmatmul.msk.f32.gmra.mxu0 %vm59_vm0, %v39_v22  ;;  %v379_v22 = vld [vmem:[%s1610_s3 + $0x70] sm:$0xff] }
  0x80   :  { %469 = vperm.xlu0 %936, %v379_v22   ;;  %v363_v22 = vld [vmem:[%s1609_s2 + $0x1f0] sm:$0xff] }
  0x84   :  { %v1068_v24 = vpop.f32.mrf.mxu0 }
  0x85   :  { %v269_v15 = vmax.f32 %v1068_v24, 0.0 }
  0x87   :  { %884 = vmatmul.msk.f32.gmra.mxu0 %vm59_vm0, %v40_v25  ;;  %v378_v25 = vld [vmem:[%s1610_s3 + $0x68] sm:$0xff] }
  0x88   :  { %464 = vperm.xlu1 %937, %v378_v25   ;;  %v352_v25 = vld [vmem:[%s1609_s2 + $0x198] sm:$0xff] }
  0x8a   :  { %v1126_v47 = vpop.f32.mrf.mxu3 }
  0x8b   :  { %v296_v4 = vmax.f32 %v1126_v47, 0.0  ;;  %v369_v47 = vld [vmem:[%s1610_s3 + $0x20] sm:$0xff] }
  0x8c   :  { %v1074_v26 = vpop.f32.mrf.mxu0 }
  0x8d   :  { %v270_v14 = vmax.f32 %v1074_v26, 0.0  ;;  %v376_v26 = vld [vmem:[%s1610_s3 + $0x58] sm:$0xff] }
  0x8e   :  { %454 = vperm.xlu2 %938, %v376_v26   ;;  %v312_v26 = vld [vmem:[%s1609_s2 + $0x58] sm:$0xff] }
  0x8f   :  { %885 = vmatmul.msk.f32.gmra.mxu0 %vm59_vm0, %v41_v27  ;;  %v375_v27 = vld [vmem:[%s1610_s3 + $0x50] sm:$0xff] }
  0x90   :  { %449 = vperm.xlu0 %936, %v375_v27   ;;  %v331_v27 = vld [vmem:[%s1609_s2 + $0xf0] sm:$0xff] }
  0x92   :  { %v1128_v49 = vpop.f32.mrf.mxu3 }
  0x93   :  { %v297_v2 = vmax.f32 %v1128_v49, 0.0 }
  0x94   :  { %v1080_v28 = vpop.f32.mrf.mxu0 }
  0x95   :  { %v271_v13 = vmax.f32 %v1080_v28, 0.0  ;;  %v307_v28 = vld [vmem:[%s1609_s2 + $0x30] sm:$0xff] }
  0x97   :  { %886 = vmatmul.msk.f32.gmra.mxu0 %vm59_vm0, %v42_v29 }
  0x9a   :  { %v1130_v51 = vpop.f32.mrf.mxu3 }
  0x9b   :  { %v298_v0 = vmax.f32 %v1130_v51, 0.0 }
  0x9c   :  { %v1086_v30 = vpop.f32.mrf.mxu0 }
  0x9d   :  { %v272_v12 = vmax.f32 %v1086_v30, 0.0  ;;  %v377_v30 = vld [vmem:[%s1610_s3 + $0x60] sm:$0xff] }
  0x9e   :  { %459 = vperm.xlu1 %937, %v377_v30  }
  0x9f   :  { %887 = vmatmul.msk.f32.gmra.mxu0 %vm59_vm0, %v43_v31  ;;  %v396_v31 = vld [vmem:[%s1610_s3 + $0xf8] sm:$0xff] }
  0xa0   :  { %554 = vperm.xlu2 %938, %v396_v31   ;;  %v333_v31 = vld [vmem:[%s1609_s2 + $0x100] sm:$0xff] }
  0xa2   :  { %v1132_v53 = vpop.f32.mrf.mxu3 }
  0xa3   :  { %v299_v62 = vmax.f32 %v1132_v53, 0.0  ;;  %v390_v53 = vld [vmem:[%s1610_s3 + $0xc8] sm:$0xff] }
  0xa4   :  { %v1092_v32 = vpop.f32.mrf.mxu0 }
  0xa5   :  { %v273_v10 = vmax.f32 %v1092_v32, 0.0  ;;  %v394_v32 = vld [vmem:[%s1610_s3 + $0xe8] sm:$0xff] }
  0xa6   :  { %544 = vperm.xlu0 %936, %v394_v32   ;;  %v356_v32 = vld [vmem:[%s1609_s2 + $0x1b8] sm:$0xff] }
  0xa7   :  { %888 = vmatmul.msk.f32.gmra.mxu0 %vm59_vm0, %v44_v33  ;;  %v309_v33 = vld [vmem:[%s1609_s2 + $0x40] sm:$0xff] }
  0xaa   :  { %v266_v58 = vpop.f32.mrf.mxu3 }
  0xab   :  { %v300_v60 = vmax.f32 %v266_v58, 0.0  ;;  %v317_v58 = vld [vmem:[%s1609_s2 + $0x80] sm:$0xff] }
  0xac   :  { %v1098_v34 = vpop.f32.mrf.mxu0 }
  0xad   :  { %670 = vmatpush.msra.mxu2 %v300_v60  ;;  %v274_v9 = vmax.f32 %v1098_v34, 0.0 }
  0xaf   :  { %889 = vmatmul.msk.f32.gmra.mxu0 %vm59_vm0, %v45_v35  ;;  %671 = vmatpush.msra.mxu2 %v299_v62  ;;  %v395_v35 = vld [vmem:[%s1610_s3 + $0xf0] sm:$0xff] }
  0xb0   :  { %549 = vperm.xlu1 %937, %v395_v35   ;;  %v335_v35 = vld [vmem:[%s1609_s2 + $0x110] sm:$0xff] }
  0xb1   :  { %672 = vmatpush.msra.mxu2 %v298_v0 }
  0xb3   :  { %673 = vmatpush.msra.mxu2 %v297_v2 }
  0xb4   :  { %v1104_v36 = vpop.f32.mrf.mxu0 }
  0xb5   :  { %674 = vmatpush.msra.mxu2 %v296_v4  ;;  %v275_v8 = vmax.f32 %v1104_v36, 0.0  ;;  %v374_v36 = vld [vmem:[%s1610_s3 + $0x48] sm:$0xff] }
  0xb6   :  { %444 = vperm.xlu2 %938, %v374_v36  }
  0xb7   :  { %890 = vmatmul.msk.f32.gmra.mxu0 %vm59_vm0, %v46_v37  ;;  %v372_v37 = vld [vmem:[%s1610_s3 + $0x38] sm:$0xff] }
  0xb8   :  { %434 = vperm.xlu0 %936, %v372_v37   ;;  %v358_v37 = vld [vmem:[%s1609_s2 + $0x1c8] sm:$0xff] }
  0xbc   :  { %v194_v38 = vpop.f32.mrf.mxu0 }
  0xbd   :  { %v276_v7 = vmax.f32 %v194_v38, 0.0  ;;  %v311_v38 = vld [vmem:[%s1609_s2 + $0x50] sm:$0xff] }
  0xbf   :  { %891 = vmatmul.msk.f32.gmra.mxu0 %vm59_vm0, %v47_v39 }
  0xc4   :  { %v197_v40 = vpop.f32.mrf.mxu0 }
  0xc5   :  { %v277_v5 = vmax.f32 %v197_v40, 0.0  ;;  %v393_v40 = vld [vmem:[%s1610_s3 + $0xe0] sm:$0xff] }
  0xc6   :  { %539 = vperm.xlu2 %938, %v393_v40  }
  0xc7   :  { %892 = vmatmul.msk.f32.gmra.mxu0 %vm59_vm0, %v48_v41  ;;  %v373_v41 = vld [vmem:[%s1610_s3 + $0x40] sm:$0xff] }
  0xc8   :  { %439 = vperm.xlu1 %937, %v373_v41   ;;  %v360_v41 = vld [vmem:[%s1609_s2 + $0x1d8] sm:$0xff] }
  0xcc   :  { %v200_v42 = vpop.f32.mrf.mxu0 }
  0xcd   :  { %v278_v3 = vmax.f32 %v200_v42, 0.0  ;;  %v391_v42 = vld [vmem:[%s1610_s3 + $0xd0] sm:$0xff] }
  0xce   :  { %529 = vperm.xlu0 %936, %v391_v42  }
  0xcf   :  { %893 = vmatmul.msk.f32.gmra.mxu0 %vm59_vm0, %v49_v43  ;;  %v313_v43 = vld [vmem:[%s1609_s2 + $0x60] sm:$0xff] }
  0xd4   :  { %v203_v44 = vpop.f32.mrf.mxu0 }
  0xd5   :  { %v279_v1 = vmax.f32 %v203_v44, 0.0 }
  0xd6   :  { %419 = vperm.xlu0 %936, %v369_v47  }
  0xd7   :  { %894 = vmatmul.msk.f32.gmra.mxu0 %vm59_vm0, %v50_v45  ;;  %v392_v45 = vld [vmem:[%s1610_s3 + $0xd8] sm:$0xff] }
  0xd8   :  { %534 = vperm.xlu1 %937, %v392_v45  }
  0xdc   :  { %v206_v46 = vpop.f32.mrf.mxu0 }
  0xdd   :  { %v280_v63 = vmax.f32 %v206_v46, 0.0  ;;  %v371_v46 = vld [vmem:[%s1610_s3 + $0x30] sm:$0xff] }
  0xde   :  { %429 = vperm.xlu2 %938, %v371_v46   ;;  %v362_v46 = vld [vmem:[%s1609_s2 + $0x1e8] sm:$0xff] }
  0xe4   :  { %v209_v48 = vpop.f32.mrf.mxu0 }
  0xe5   :  { %v281_v59 = vmax.f32 %v209_v48, 0.0  ;;  %v315_v48 = vld [vmem:[%s1609_s2 + $0x70] sm:$0xff] }
  0xe6   :  { %524 = vperm.xlu2 %938, %v390_v53   ;;  %v386_v53 = vld [vmem:[%s1610_s3 + $0xa8] sm:$0xff] }
  0xe8   :  { %v1340_v30 = vpop.permute.xlu2 %454 }
  0xec   :  { %v212_v50 = vpop.f32.mrf.mxu0 }
  0xed   :  { %v282_v57 = vmax.f32 %v212_v50, 0.0  ;;  %v351_v50 = vld [vmem:[%s1609_s2 + $0x190] sm:$0xff] }
  0xf4   :  { %v215_v52 = vpop.f32.mrf.mxu0 }
  0xf5   :  { %v283_v56 = vmax.f32 %v215_v52, 0.0 }
  0xfa   :  { %v1356_v36 = vpop.permute.xlu2 %554  ;;  %v1380_v45 = vpop.permute.xlu1 %464 }
  0xfc   :  { %v218_v54 = vpop.f32.mrf.mxu0 }
  0xfd   :  { %v284_v55 = vmax.f32 %v218_v54, 0.0  ;;  %v370_v54 = vld [vmem:[%s1610_s3 + $0x28] sm:$0xff] }
  0xfe   :  { %424 = vperm.xlu1 %937, %v370_v54  }
  0xff   :  { %557 = vmatpush.msra.mxu1 %v284_v55  ;;  %903 = vmatpush.msrb.mxu3 %v284_v55 }
 0x101   :  { %558 = vmatpush.msra.mxu1 %v283_v56  ;;  %904 = vmatpush.msrb.mxu3 %v283_v56  ;;  %v388_v56 = vld [vmem:[%s1610_s3 + $0xb8] sm:$0xff] }
 0x102   :  { %514 = vperm.xlu0 %936, %v388_v56  }
 0x103   :  { %559 = vmatpush.msra.mxu1 %v282_v57  ;;  %905 = vmatpush.msrb.mxu3 %v282_v57 }
 0x104   :  { %v1134_v61 = vpop.f32.mrf.mxu0 }
 0x105   :  { %560 = vmatpush.msra.mxu1 %v281_v59  ;;  %906 = vmatpush.msrb.mxu3 %v281_v59  ;;  %v353_v59 = vld [vmem:[%s1609_s2 + $0x1a0] sm:$0xff] }
 0x107   :  { %561 = vmatpush.msra.mxu1 %v280_v63  ;;  %907 = vmatpush.msrb.mxu3 %v280_v63  ;;  %v389_v63 = vld [vmem:[%s1610_s3 + $0xc0] sm:$0xff] }
 0x108   :  { %519 = vperm.xlu1 %937, %v389_v63  }
 0x109   :  { %562 = vmatpush.msra.mxu1 %v279_v1  ;;  %908 = vmatpush.msrb.mxu3 %v279_v1 }
 0x10b   :  { %563 = vmatpush.msra.mxu1 %v278_v3  ;;  %909 = vmatpush.msrb.mxu3 %v278_v3 }
 0x10c   :  { %v1140_v6 = vpop.f32.mrf.mxu0 }
 0x10d   :  { %564 = vmatpush.msra.mxu1 %v277_v5  ;;  %910 = vmatpush.msrb.mxu3 %v277_v5  ;;  %v355_v5 = vld [vmem:[%s1609_s2 + $0x1b0] sm:$0xff] }
 0x10f   :  { %565 = vmatpush.msra.mxu1 %v276_v7  ;;  %911 = vmatpush.msrb.mxu3 %v276_v7 }
 0x110   :  { %v1372_v42 = vpop.permute.xlu2 %444  ;;  %v1401_v54 = vpop.permute.xlu1 %459 }
 0x111   :  { %566 = vmatpush.msra.mxu1 %v275_v8  ;;  %912 = vmatpush.msrb.mxu3 %v275_v8  ;;  %v286_v8 = vmax.f32 %v1140_v6, 0.0  ;;  %v321_v6 = vld [vmem:[%s1609_s2 + $0xa0] sm:$0xff] }
 0x113   :  { %567 = vmatpush.msra.mxu1 %v274_v9  ;;  %913 = vmatpush.msrb.mxu3 %v274_v9  ;;  %v387_v9 = vld [vmem:[%s1610_s3 + $0xb0] sm:$0xff] }
 0x114   :  { %v1145_v11 = vpop.f32.mrf.mxu0 }
 0x115   :  { %568 = vmatpush.msra.mxu1 %v273_v10  ;;  %914 = vmatpush.msrb.mxu3 %v273_v10  ;;  %v287_v7 = vmax.f32 %v1145_v11, 0.0  ;;  %v367_v10 = vld [vmem:[%s1610_s3 + $0x10] sm:$0xff]  ;;  %v302_v11 = vld [vmem:[%s1609_s2 + $0x8] sm:$0xff] }
 0x116   :  { %409 = vperm.xlu1 %937, %v367_v10  }
 0x117   :  { %569 = vmatpush.msra.mxu1 %v272_v12  ;;  %915 = vmatpush.msrb.mxu3 %v272_v12  ;;  %v285_v12 = vmax.f32 %v1134_v61, 0.0  ;;  %v365_v61 = vld [vmem:[%s1610_s3] sm:$0xff] }
 0x119   :  { %570 = vmatpush.msra.mxu1 %v271_v13  ;;  %916 = vmatpush.msrb.mxu3 %v271_v13  ;;  %v357_v13 = vld [vmem:[%s1609_s2 + $0x1c0] sm:$0xff] }
 0x11b   :  { %571 = vmatpush.msra.mxu1 %v270_v14  ;;  %917 = vmatpush.msrb.mxu3 %v270_v14  ;;  %v304_v14 = vld [vmem:[%s1609_s2 + $0x18] sm:$0xff] }
 0x11c   :  { %v1154_v17 = vpop.f32.mrf.mxu0 }
 0x11d   :  { %572 = vmatpush.msra.mxu1 %v269_v15  ;;  %918 = vmatpush.msrb.mxu3 %v269_v15  ;;  %v288_v3 = vmax.f32 %v1154_v17, 0.0  ;;  %v323_v15 = vld [vmem:[%s1609_s2 + $0xb0] sm:$0xff]  ;;  %v306_v17 = vld [vmem:[%s1609_s2 + $0x28] sm:$0xff] }
 0x11e   :  { %573 = vmatmul.f32.vlgmr.msra.gmra.mxu1 %v301_v16  ;;  %648 = vmatmul.f32.vlgmr.msrb.gmra.mxu3 %v351_v50  ;;  %v359_v16 = vld [vmem:[%s1609_s2 + $0x1d0] sm:$0xff] }
 0x11f   :  { %919 = vmatpush.msra.mxu3 %v300_v60  ;;  %504 = vperm.xlu1 %937, %v386_v53  }
 0x121   :  { %920 = vmatpush.msra.mxu3 %v299_v62 }
 0x123   :  { %921 = vmatpush.msra.mxu3 %v298_v0  ;;  %v368_v0 = vld [vmem:[%s1610_s3 + $0x18] sm:$0xff] }
 0x124   :  { %v1162_v21 = vpop.f32.mrf.mxu0  ;;  %414 = vperm.xlu2 %938, %v368_v0   ;;  %v1422_v0 = vpop.permute.xlu1 %549 }
 0x125   :  { %922 = vmatpush.msra.mxu3 %v297_v2  ;;  %v289_v1 = vmax.f32 %v1162_v21, 0.0  ;;  %v366_v2 = vld [vmem:[%s1610_s3 + $0x8] sm:$0xff]  ;;  %v327_v21 = vld [vmem:[%s1609_s2 + $0xd0] sm:$0xff] }
 0x126   :  { %576 = vmatmul.f32.gmra.mxu1 %v303_v20  ;;  %651 = vmatmul.f32.gmra.mxu3 %v353_v59  ;;  %v308_v20 = vld [vmem:[%s1609_s2 + $0x38] sm:$0xff]  ;;  %v343_v59 = vld [vmem:[%s1609_s2 + $0x150] sm:$0xff] }
 0x127   :  { %923 = vmatpush.msra.mxu3 %v296_v4  ;;  %v319_v4 = vld [vmem:[%s1609_s2 + $0x90] sm:$0xff]  ;;  %404 = vperm.xlu0 %936, %v366_v2  }
 0x12c   :  { %v1170_v24 = vpop.f32.mrf.mxu0  ;;  %509 = vperm.xlu2 %938, %v387_v9  }
 0x12d   :  { %v290_v62 = vmax.f32 %v1170_v24, 0.0  ;;  %v329_v24 = vld [vmem:[%s1609_s2 + $0xe0] sm:$0xff] }
 0x12e   :  { %579 = vmatmul.f32.gmra.mxu1 %v305_v23  ;;  %654 = vmatmul.f32.gmra.mxu3 %v355_v5  ;;  %v310_v23 = vld [vmem:[%s1609_s2 + $0x48] sm:$0xff] }
 0x134   :  { %v1184_v29 = vpop.f32.mrf.mxu0  ;;  %399 = vperm.xlu2 %938, %v365_v61  }
 0x135   :  { %v291_v60 = vmax.f32 %v1184_v29, 0.0  ;;  %v314_v29 = vld [vmem:[%s1609_s2 + $0x68] sm:$0xff] }
 0x136   :  { %582 = vmatmul.f32.gmra.mxu1 %v307_v28  ;;  %657 = vmatmul.f32.gmra.mxu3 %v357_v13  ;;  %v354_v28 = vld [vmem:[%s1609_s2 + $0x1a8] sm:$0xff] }
 0x137   :  { %v330_v13 = vld [vmem:[%s1609_s2 + $0xe8] sm:$0xff] }
 0x13a   :  { %v1440_v9 = vpop.permute.xlu1 %439 }
 0x13c   :  { %v242_v34 = vpop.f32.mrf.mxu0 }
 0x13d   :  { %v292_v57 = vmax.f32 %v242_v34, 0.0  ;;  %v1351_v34 = vpop.permute.xlu0 %474 }
 0x13e   :  { %585 = vmatmul.f32.gmra.mxu1 %v309_v33  ;;  %660 = vmatmul.f32.gmra.mxu3 %v359_v16  ;;  %v316_v33 = vld [vmem:[%s1609_s2 + $0x78] sm:$0xff] }
 0x144   :  { %v245_v39 = vpop.f32.mrf.mxu0 }
 0x145   :  { %v293_v55 = vmax.f32 %v245_v39, 0.0  ;;  %v337_v39 = vld [vmem:[%s1609_s2 + $0x120] sm:$0xff]  ;;  %v1367_v40 = vpop.permute.xlu0 %469 }
 0x146   :  { %588 = vmatmul.f32.gmra.mxu1 %v311_v38  ;;  %663 = vmatmul.f32.gmra.mxu3 %v361_v19  ;;  %v318_v38 = vld [vmem:[%s1609_s2 + $0x88] sm:$0xff] }
 0x14a   :  { %v1450_v61 = vpop.permute.xlu1 %534 }
 0x14c   :  { %v248_v44 = vpop.f32.mrf.mxu0 }
 0x14d   :  { %v294_v52 = vmax.f32 %v248_v44, 0.0  ;;  %v339_v44 = vld [vmem:[%s1609_s2 + $0x130] sm:$0xff]  ;;  %v1385_v47 = vpop.permute.xlu0 %449 }
 0x14e   :  { %591 = vmatmul.f32.gmra.mxu1 %v313_v43  ;;  %666 = vmatmul.f32.gmra.mxu3 %v363_v22  ;;  %v320_v43 = vld [vmem:[%s1609_s2 + $0x98] sm:$0xff]  ;;  %v334_v22 = vld [vmem:[%s1609_s2 + $0x108] sm:$0xff] }
 0x154   :  { %v251_v49 = vpop.f32.mrf.mxu0 }
 0x155   :  { %v295_v51 = vmax.f32 %v251_v49, 0.0  ;;  %v322_v49 = vld [vmem:[%s1609_s2 + $0xa8] sm:$0xff]  ;;  %v1406_v56 = vpop.permute.xlu0 %544 }
 0x156   :  { %594 = vmatmul.f32.gmra.mxu1 %v315_v48  ;;  %v1387_v48 = vpop.permute.xlu2 %539 }
 0x157   :  { %675 = vmatpush.msra.mxu2 %v295_v51  ;;  %924 = vmatpush.msra.mxu3 %v295_v51  ;;  %v341_v51 = vld [vmem:[%s1609_s2 + $0x140] sm:$0xff] }
 0x159   :  { %676 = vmatpush.msra.mxu2 %v294_v52  ;;  %925 = vmatpush.msra.mxu3 %v294_v52  ;;  %v364_v52 = vld [vmem:[%s1609_s2 + $0x1f8] sm:$0xff] }
 0x15b   :  { %677 = vmatpush.msra.mxu2 %v293_v55  ;;  %926 = vmatpush.msra.mxu3 %v293_v55  ;;  %v385_v55 = vld [vmem:[%s1610_s3 + $0xa0] sm:$0xff] }
 0x15c   :  { %499 = vperm.xlu0 %936, %v385_v55   ;;  %v342_v55 = vld [vmem:[%s1609_s2 + $0x148] sm:$0xff] }
 0x15d   :  { %678 = vmatpush.msra.mxu2 %v292_v57  ;;  %927 = vmatpush.msra.mxu3 %v292_v57  ;;  %v324_v57 = vld [vmem:[%s1609_s2 + $0xb8] sm:$0xff]  ;;  %v1427_v2 = vpop.permute.xlu0 %434 }
 0x15e   :  { %597 = vmatmul.f32.gmra.mxu1 %v317_v58  ;;  %v1411_v58 = vpop.permute.xlu2 %429 }
 0x15f   :  { %679 = vmatpush.msra.mxu2 %v291_v60  ;;  %928 = vmatpush.msra.mxu3 %v291_v60  ;;  %v384_v60 = vld [vmem:[%s1610_s3 + $0x98] sm:$0xff] }
 0x160   :  { %494 = vperm.xlu1 %937, %v384_v60  }
 0x161   :  { %680 = vmatpush.msra.mxu2 %v290_v62  ;;  %929 = vmatpush.msra.mxu3 %v290_v62  ;;  %v382_v62 = vld [vmem:[%s1610_s3 + $0x88] sm:$0xff] }
 0x163   :  { %681 = vmatpush.msra.mxu2 %v289_v1  ;;  %930 = vmatpush.msra.mxu3 %v289_v1  ;;  %v326_v1 = vld [vmem:[%s1609_s2 + $0xc8] sm:$0xff] }
 0x164   :  { %484 = vperm.xlu0 %936, %v382_v62  }
 0x165   :  { %682 = vmatpush.msra.mxu2 %v288_v3  ;;  %931 = vmatpush.msra.mxu3 %v288_v3  ;;  %v1442_v10 = vpop.permute.xlu0 %529 }
 0x166   :  { %600 = vmatmul.f32.gmra.mxu1 %v319_v4  ;;  %v1429_v3 = vpop.permute.xlu2 %524  ;;  %v345_v4 = vld [vmem:[%s1609_s2 + $0x160] sm:$0xff] }
 0x167   :  { %683 = vmatpush.msra.mxu2 %v287_v7  ;;  %932 = vmatpush.msra.mxu3 %v287_v7  ;;  %v381_v7 = vld [vmem:[%s1610_s3 + $0x80] sm:$0xff] }
 0x168   :  { %479 = vperm.xlu1 %937, %v381_v7  }
 0x169   :  { %684 = vmatpush.msra.mxu2 %v286_v8  ;;  %933 = vmatpush.msra.mxu3 %v286_v8  ;;  %v328_v8 = vld [vmem:[%s1609_s2 + $0xd8] sm:$0xff] }
 0x16b   :  { %685 = vmatpush.msra.mxu2 %v285_v12  ;;  %934 = vmatpush.msra.mxu3 %v285_v12  ;;  %v347_v12 = vld [vmem:[%s1609_s2 + $0x170] sm:$0xff] }
 0x16c   :  { %686 = vmatmul.f32.vlgmr.msra.gmra.mxu2 %v302_v11  ;;  %761 = vmatmul.f32.vlgmr.msra.gmra.mxu3 %v352_v25 }
 0x16e   :  { %603 = vmatmul.f32.gmra.mxu1 %v321_v6 }
 0x174   :  { %689 = vmatmul.f32.gmra.mxu2 %v304_v14  ;;  %764 = vmatmul.f32.gmra.mxu3 %v354_v28  ;;  %v349_v14 = vld [vmem:[%s1609_s2 + $0x180] sm:$0xff] }
 0x176   :  { %606 = vmatmul.f32.gmra.mxu1 %v323_v15  ;;  %v420_v15 = vpop.permute.xlu0 %419 }
 0x17c   :  { %692 = vmatmul.f32.gmra.mxu2 %v306_v17  ;;  %767 = vmatmul.f32.gmra.mxu3 %v356_v32  ;;  %v332_v17 = vld [vmem:[%s1609_s2 + $0xf8] sm:$0xff] }
 0x17e   :  { %609 = vmatmul.f32.gmra.mxu1 %v325_v18  ;;  %v415_v11 = vpop.permute.xlu2 %414  ;;  %v383_v18 = vld [vmem:[%s1610_s3 + $0x90] sm:$0xff] }
 0x17f   :  { %489 = vperm.xlu2 %938, %v383_v18   ;;  %v348_v18 = vld [vmem:[%s1609_s2 + $0x178] sm:$0xff] }
 0x184   :  { %695 = vmatmul.f32.gmra.mxu2 %v308_v20  ;;  %770 = vmatmul.f32.gmra.mxu3 %v358_v37  ;;  %v425_v20 = vpop.permute.xlu1 %424 }
 0x186   :  { %612 = vmatmul.f32.gmra.mxu1 %v327_v21  ;;  %v1455_v16 = vpop.permute.xlu2 %509  ;;  %v1463_v21 = vpop.permute.xlu0 %514 }
 0x187   :  { %1614 = vst [vmem:[#allocation3_spill] sm:$0xff] %v1455_v16 }
 0x18c   :  { %698 = vmatmul.f32.gmra.mxu2 %v310_v23  ;;  %773 = vmatmul.f32.gmra.mxu3 %v360_v41 }
 0x18e   :  { %615 = vmatmul.f32.gmra.mxu1 %v329_v24  ;;  %v400_v23 = vpop.permute.xlu2 %399 }
 0x194   :  { %701 = vmatmul.f32.gmra.mxu2 %v312_v26  ;;  %776 = vmatmul.f32.gmra.mxu3 %v362_v46 }
 0x196   :  { %618 = vmatmul.f32.gmra.mxu1 %v331_v27  ;;  %v1468_v27 = vpop.permute.xlu1 %519 }
 0x19b   :  { %v574_v50 = vpop.f32.mrf.mxu1 }
 0x19c   :  { %704 = vmatmul.f32.gmra.mxu2 %v314_v29  ;;  %779 = vmatmul.f32.gmra.mxu3 %v364_v52  ;;  %v575_v24 = vadd.f32 %v574_v50, %v400_v23  ;;  %v336_v29 = vld [vmem:[%s1609_s2 + $0x118] sm:$0xff] }
 0x19d   :  { %v340_v50 = vld [vmem:[%s1609_s2 + $0x138] sm:$0xff] }
 0x19e   :  { %621 = vmatmul.f32.gmra.mxu1 %v333_v31  ;;  %v405_v31 = vpop.permute.xlu0 %404 }
 0x1a3   :  { %v577_v63 = vpop.f32.mrf.mxu1 }
 0x1a4   :  { %707 = vmatmul.f32.gmra.mxu2 %v316_v33  ;;  %v578_v32 = vadd.f32 %v577_v63, %v405_v31 }
 0x1a6   :  { %624 = vmatmul.f32.gmra.mxu1 %v335_v35 }
 0x1ab   :  { %v580_v5 = vpop.f32.mrf.mxu1 }
 0x1ac   :  { %710 = vmatmul.f32.gmra.mxu2 %v318_v38  ;;  %v338_v38 = vld [vmem:[%s1609_s2 + $0x128] sm:$0xff] }
 0x1ae   :  { %627 = vmatmul.f32.gmra.mxu1 %v337_v39  ;;  %v410_v39 = vpop.permute.xlu1 %409 }
 0x1af   :  { %v581_v41 = vadd.f32 %v580_v5, %v410_v39 }
 0x1b3   :  { %v583_v6 = vpop.f32.mrf.mxu1 }
 0x1b4   :  { %713 = vmatmul.f32.gmra.mxu2 %v320_v43 }
 0x1b6   :  { %630 = vmatmul.f32.gmra.mxu1 %v339_v44  ;;  %v1480_v44 = vpop.f32.mrf.mxu3 }
 0x1bb   :  { %v586_v19 = vpop.f32.mrf.mxu1 }
 0x1bc   :  { %716 = vmatmul.f32.gmra.mxu2 %v322_v49  ;;  %v587_v60 = vadd.f32 %v586_v19, %v420_v15 }
 0x1be   :  { %633 = vmatmul.f32.gmra.mxu1 %v341_v51  ;;  %v584_v51 = vadd.f32 %v583_v6, %v415_v11  ;;  %v346_v11 = vld [vmem:[%s1609_s2 + $0x168] sm:$0xff] }
 0x1c3   :  { %v589_v25 = vpop.f32.mrf.mxu1 }
 0x1c4   :  { %719 = vmatmul.f32.gmra.mxu2 %v324_v57  ;;  %v1492_v57 = vpop.f32.mrf.mxu3 }
 0x1c6   :  { %636 = vmatmul.f32.gmra.mxu1 %v343_v59 }
 0x1cb   :  { %v592_v33 = vpop.f32.mrf.mxu1 }
 0x1cc   :  { %722 = vmatmul.f32.gmra.mxu2 %v326_v1  ;;  %v344_v1 = vld [vmem:[%s1609_s2 + $0x158] sm:$0xff]  ;;  %v1499_v5 = vpop.f32.mrf.mxu3  ;;  %v593_v6 = vadd.f32 %v592_v33, %v1411_v58 }
 0x1ce   :  { %639 = vmatmul.f32.gmra.mxu1 %v345_v4  ;;  %v590_v4 = vadd.f32 %v589_v25, %v425_v20 }
 0x1d3   :  { %v595_v49 = vpop.f32.mrf.mxu1 }
 0x1d4   :  { %725 = vmatmul.f32.gmra.mxu2 %v328_v8  ;;  %v596_v19 = vadd.f32 %v595_v49, %v1427_v2 }
 0x1d6   :  { %642 = vmatmul.f32.gmra.mxu1 %v347_v12 }
 0x1db   :  { %v598_v59 = vpop.f32.mrf.mxu1 }
 0x1dc   :  { %728 = vmatmul.f32.gmra.mxu2 %v330_v13  ;;  %v1507_v13 = vpop.f32.mrf.mxu3  ;;  %v599_v25 = vadd.f32 %v598_v59, %v1440_v9 }
 0x1de   :  { %645 = vmatmul.f32.gmra.mxu1 %v349_v14 }
 0x1e3   :  { %v601_v7 = vpop.f32.mrf.mxu1 }
 0x1e4   :  { %731 = vmatmul.f32.gmra.mxu2 %v332_v17 }
 0x1eb   :  { %v604_v14 = vpop.f32.mrf.mxu1 }
 0x1ec   :  { %734 = vmatmul.f32.gmra.mxu2 %v334_v22  ;;  %v1515_v22 = vpop.f32.mrf.mxu3 }
 0x1ef   :  { %v687_v26 = vpop.f32.mrf.mxu2 }
 0x1f0   :  { %v1470_v28 = vadd.f32 %v687_v26, %v575_v24  ;;  %v350_v24 = vld [vmem:[%s1609_s2 + $0x188] sm:$0xff] }
 0x1f3   :  { %v607_v58 = vpop.f32.mrf.mxu1 }
 0x1f4   :  { %737 = vmatmul.f32.gmra.mxu2 %v336_v29  ;;  %v1525_v31 = vpop.f32.mrf.mxu3 }
 0x1f7   :  { %v690_v35 = vpop.f32.mrf.mxu2 }
 0x1f8   :  { %v1475_v37 = vadd.f32 %v690_v35, %v578_v32 }
 0x1fb   :  { %v610_v2 = vpop.f32.mrf.mxu1 }
 0x1fc   :  { %740 = vmatmul.f32.gmra.mxu2 %v338_v38  ;;  %v1527_v33 = vpop.f32.mrf.mxu3 }
 0x1ff   :  { %v693_v43 = vpop.f32.mrf.mxu2 }
 0x200   :  { %v1482_v46 = vadd.f32 %v693_v43, %v581_v41 }
 0x203   :  { %v613_v35 = vpop.f32.mrf.mxu1 }
 0x204   :  { %743 = vmatmul.f32.gmra.mxu2 %v340_v50  ;;  %v1529_v39 = vpop.f32.mrf.mxu3 }
 0x207   :  { %v696_v52 = vpop.f32.mrf.mxu2 }
 0x208   :  { %v1487_v53 = vadd.f32 %v696_v52, %v584_v51  ;;  %v1533_v51 = vpop.permute.xlu1 %504 }
 0x209   :  { %1615 = vst [vmem:[#allocation4_spill] sm:$0xff] %v1533_v51 }
 0x20b   :  { %v616_v41 = vpop.f32.mrf.mxu1 }
 0x20c   :  { %746 = vmatmul.f32.gmra.mxu2 %v342_v55  ;;  %v1531_v50 = vpop.f32.mrf.mxu3 }
 0x20f   :  { %v699_v62 = vpop.f32.mrf.mxu2 }
 0x210   :  { %v1494_v63 = vadd.f32 %v699_v62, %v587_v60  ;;  %v1537_v62 = vpop.permute.xlu1 %494 }
 0x211   :  { %1616 = vst [vmem:[#allocation5_spill] sm:$0xff] %v1537_v62 }
 0x213   :  { %v619_v9 = vpop.f32.mrf.mxu1 }
 0x214   :  { %749 = vmatmul.f32.gmra.mxu2 %v344_v1  ;;  %v1535_v55 = vpop.f32.mrf.mxu3  ;;  %v617_v1 = vadd.f32 %v616_v41, %v1367_v40  ;;  %v605_v40 = vadd.f32 %v604_v14, %v1385_v47 }
 0x217   :  { %v702_v8 = vpop.f32.mrf.mxu2 }
 0x218   :  { %v1501_v12 = vadd.f32 %v702_v8, %v590_v4  ;;  %v480_v51 = vpop.permute.xlu1 %479 }
 0x21b   :  { %v622_v59 = vpop.f32.mrf.mxu1 }
 0x21c   :  { %752 = vmatmul.f32.gmra.mxu2 %v346_v11  ;;  %v1540_v4 = vpop.f32.mrf.mxu3  ;;  %v614_v11 = vadd.f32 %v613_v35, %v1380_v45  ;;  %v602_v45 = vadd.f32 %v601_v7, %v1372_v42 }
 0x21f   :  { %v705_v15 = vpop.f32.mrf.mxu2 }
 0x220   :  { %v1509_v17 = vadd.f32 %v705_v15, %v593_v6  ;;  %v620_v6 = vadd.f32 %v619_v9, %v1351_v34 }
 0x223   :  { %v625_v8 = vpop.f32.mrf.mxu1 }
 0x224   :  { %755 = vmatmul.f32.gmra.mxu2 %v348_v18  ;;  %v611_v18 = vadd.f32 %v610_v2, %v1401_v54  ;;  %v774_v35 = vpop.f32.mrf.mxu3  ;;  %v623_v54 = vadd.f32 %v622_v59, %v480_v51 }
 0x227   :  { %v708_v20 = vpop.f32.mrf.mxu2 }
 0x228   :  { %v1517_v23 = vadd.f32 %v708_v20, %v596_v19 }
 0x22b   :  { %v1550_v2 = vpop.f32.mrf.mxu1 }
 0x22c   :  { %758 = vmatmul.f32.gmra.mxu2 %v350_v24  ;;  %v1545_v24 = vpop.permute.xlu0 %499  ;;  %v777_v51 = vpop.f32.mrf.mxu3 }
 0x22f   :  { %v711_v26 = vpop.f32.mrf.mxu2 }
 0x230   :  { %v1523_v29 = vadd.f32 %v711_v26, %v599_v25  ;;  %v608_v25 = vadd.f32 %v607_v58, %v1340_v30 }
 0x234   :  { %v485_v14 = vpop.permute.xlu0 %484 }
 0x235   :  { %v626_v7 = vadd.f32 %v625_v8, %v485_v14  ;;  %v1618_v14 = vld [vmem:[#allocation4_spill] sm:$0xff] }
 0x237   :  { %v714_v32 = vpop.f32.mrf.mxu2 }
 0x23f   :  { %v717_v38 = vpop.f32.mrf.mxu2 }
 0x247   :  { %v720_v43 = vpop.f32.mrf.mxu2 }
 0x248   :  { %v721_v34 = vadd.f32 %v720_v43, %v608_v25  ;;  %v783_v25 = vmax.f32 %v1470_v28, 0.0 }
 0x24a   :  { %v794_v47 = vmax.f32 %v721_v34, 0.0 }
 0x24f   :  { %v723_v49 = vpop.f32.mrf.mxu2 }
 0x250   :  { %v724_v41 = vadd.f32 %v723_v49, %v611_v18  ;;  %v780_v18 = vpop.f32.mrf.mxu3 }
 0x252   :  { %v795_v30 = vmax.f32 %v724_v41, 0.0 }
 0x257   :  { %v726_v52 = vpop.f32.mrf.mxu2 }
 0x258   :  { %v727_v26 = vadd.f32 %v726_v52, %v614_v11  ;;  %v715_v52 = vadd.f32 %v714_v32, %v602_v45  ;;  %v789_v32 = vmax.f32 %v1509_v17, 0.0  ;;  %v788_v11 = vmax.f32 %v1501_v12, 0.0 }
 0x259   :  { %v662_v12 = vadd.f32 %v1515_v22, %v1406_v56  ;;  %v653_v56 = vadd.f32 %v1492_v57, %v1442_v10 }
 0x25a   :  { %v796_v9 = vmax.f32 %v727_v26, 0.0  ;;  %v792_v42 = vmax.f32 %v715_v52, 0.0 }
 0x25f   :  { %v729_v60 = vpop.f32.mrf.mxu2 }
 0x260   :  { %v730_v19 = vadd.f32 %v729_v60, %v617_v1  ;;  %v718_v1 = vadd.f32 %v717_v38, %v605_v40  ;;  %v1557_v38 = vpop.f32.mrf.mxu1 }
 0x262   :  { %v797_v16 = vmax.f32 %v730_v19, 0.0  ;;  %v793_v49 = vmax.f32 %v718_v1, 0.0  ;;  %v785_v19 = vmax.f32 %v1482_v46, 0.0  ;;  %v775_v46 = vadd.f32 %v774_v35, %v662_v12  ;;  %v1617_v1 = vld [vmem:[#allocation3_spill] sm:$0xff] }
 0x264   :  { %v812_v26 = vmax.f32 %v775_v46, 0.0 }
 0x267   :  { %v732_v15 = vpop.f32.mrf.mxu2 }
 0x268   :  { %v733_v20 = vadd.f32 %v732_v15, %v620_v6  ;;  %v787_v6 = vmax.f32 %v1494_v63, 0.0  ;;  %v786_v15 = vmax.f32 %v1487_v53, 0.0  ;;  %v634_v17 = vpop.f32.mrf.mxu1  ;;  %v784_v63 = vmax.f32 %v1475_v37, 0.0 }
 0x26a   :  { %v798_v62 = vmax.f32 %v733_v20, 0.0 }
 0x26c   :  { %823 = vmatpush.msrb.mxu3 %v798_v62  ;;  %v790_v62 = vmax.f32 %v1517_v23, 0.0  ;;  %v665_v23 = vadd.f32 %v1525_v31, %v1422_v0  ;;  %v656_v0 = vadd.f32 %v1499_v5, %v1450_v61  ;;  %v766_v61 = vadd.f32 %v1531_v50, %v653_v56 }
 0x26e   :  { %824 = vmatpush.msrb.mxu3 %v797_v16  ;;  %v791_v16 = vmax.f32 %v1523_v29, 0.0  ;;  %v668_v29 = vadd.f32 %v1527_v33, %v1356_v36  ;;  %v659_v36 = vadd.f32 %v1507_v13, %v1387_v48  ;;  %v778_v53 = vadd.f32 %v777_v51, %v665_v23 }
 0x26f   :  { %v735_v60 = vpop.f32.mrf.mxu2  ;;  %v650_v48 = vadd.f32 %v1480_v44, %v1429_v3  ;;  %v769_v13 = vadd.f32 %v1535_v55, %v656_v0  ;;  %v809_v57 = vmax.f32 %v766_v61, 0.0  ;;  %v815_v44 = vld [vmem:[%s1611_s4] sm:$0x3] }
 0x270   :  { %v1552_v58 = vadd.f32 %v735_v60, %v623_v54  ;;  %825 = vmatpush.msrb.mxu3 %v796_v9  ;;  %v781_v20 = vadd.f32 %v780_v18, %v668_v29  ;;  %v772_v37 = vadd.f32 %v1540_v4, %v659_v36  ;;  %v813_v22 = vmax.f32 %v778_v53, 0.0  ;;  %v637_v28 = vpop.f32.mrf.mxu1 }
 0x271   :  { %v763_v41 = vadd.f32 %v1529_v39, %v650_v48  ;;  %v810_v10 = vmax.f32 %v769_v13, 0.0  ;;  %v819_v55 = vperm.slane %v815_v44, 0 }
 0x272   :  { %826 = vmatpush.msrb.mxu3 %v795_v30  ;;  %v814_v31 = vmax.f32 %v781_v20, 0.0  ;;  %v811_v5 = vmax.f32 %v772_v37, 0.0  ;;  %v799_v12 = vmax.f32 %v1552_v58, 0.0 }
 0x273   :  { %v808_v4 = vmax.f32 %v763_v41, 0.0 }
 0x274   :  { %827 = vmatpush.msrb.mxu3 %v794_v47 }
 0x276   :  { %828 = vmatpush.msrb.mxu3 %v793_v49  ;;  %v638_v49 = vadd.f32 %v637_v28, %v1618_v14 }
 0x277   :  { %v738_v43 = vpop.f32.mrf.mxu2 }
 0x278   :  { %v1555_v59 = vadd.f32 %v738_v43, %v626_v7  ;;  %829 = vmatpush.msrb.mxu3 %v792_v42  ;;  %v640_v45 = vpop.f32.mrf.mxu1  ;;  %v635_v43 = vadd.f32 %v634_v17, %v1545_v24 }
 0x279   :  { %v641_v30 = vadd.f32 %v640_v45, %v1617_v1 }
 0x27a   :  { %830 = vmatpush.msrb.mxu3 %v791_v16 }
 0x27c   :  { %831 = vmatpush.msrb.mxu3 %v790_v62  ;;  %v490_v62 = vpop.permute.xlu2 %489 }
 0x27e   :  { %832 = vmatpush.msrb.mxu3 %v789_v32  ;;  %v1619_v32 = vld [vmem:[#allocation5_spill] sm:$0xff] }
 0x27f   :  { %v1562_v8 = vpop.f32.mrf.mxu2 }
 0x280   :  { %833 = vmatpush.msrb.mxu3 %v788_v11  ;;  %v643_v34 = vpop.f32.mrf.mxu1 }
 0x281   :  { %v644_v39 = vadd.f32 %v643_v34, %v1463_v21  ;;  %v632_v21 = vadd.f32 %v1557_v38, %v1619_v32  ;;  %v820_v38 = vperm.slane %v815_v44, 1 }
 0x282   :  { %834 = vmatpush.msrb.mxu3 %v787_v6  ;;  %v629_v6 = vadd.f32 %v1550_v2, %v490_v62 }
 0x284   :  { %835 = vmatpush.msrb.mxu3 %v786_v15  ;;  %v742_v18 = vadd.f32 %v1562_v8, %v629_v6  ;;  %v817_v8 = vstv %s1612_s5 }
 0x286   :  { %836 = vmatpush.msrb.mxu3 %v785_v19  ;;  %v801_v17 = vmax.f32 %v742_v18, 0.0  ;;  %v800_v19 = vmax.f32 %v1555_v59, 0.0 }
 0x287   :  { %v744_v33 = vpop.f32.mrf.mxu2 }
 0x288   :  { %837 = vmatpush.msrb.mxu3 %v784_v63  ;;  %v646_v9 = vpop.f32.mrf.mxu1  ;;  %v745_v29 = vadd.f32 %v744_v33, %v632_v21 }
 0x289   :  { %v647_v54 = vadd.f32 %v646_v9, %v1468_v27 }
 0x28a   :  { %838 = vmatpush.msrb.mxu3 %v783_v25  ;;  %v802_v24 = vmax.f32 %v745_v29, 0.0 }
 0x28b   :  { %839 = vmatmul.f32.vlgmr.msrb.gmra.mxu3 %v819_v55 }
 0x28c   :  { %843 = vmatpush.msra.mxu3 %v814_v31 }
 0x28e   :  { %844 = vmatpush.msra.mxu3 %v813_v22 }
 0x28f   :  { %v747_v40 = vpop.f32.mrf.mxu2 }
 0x290   :  { %845 = vmatpush.msra.mxu3 %v812_v26  ;;  %v748_v11 = vadd.f32 %v747_v40, %v635_v43 }
 0x292   :  { %846 = vmatpush.msra.mxu3 %v811_v5  ;;  %v803_v23 = vmax.f32 %v748_v11, 0.0 }
 0x294   :  { %847 = vmatpush.msra.mxu3 %v810_v10 }
 0x296   :  { %848 = vmatpush.msra.mxu3 %v809_v57 }
 0x297   :  { %v750_v3 = vpop.f32.mrf.mxu2 }
 0x298   :  { %849 = vmatpush.msra.mxu3 %v808_v4  ;;  %v751_v16 = vadd.f32 %v750_v3, %v638_v49 }
 0x29a   :  { %v804_v15 = vmax.f32 %v751_v16, 0.0 }
 0x29f   :  { %v753_v50 = vpop.f32.mrf.mxu2 }
 0x2a0   :  { %v754_v42 = vadd.f32 %v753_v50, %v641_v30 }
 0x2a2   :  { %v805_v27 = vmax.f32 %v754_v42, 0.0 }
 0x2a7   :  { %v756_v35 = vpop.f32.mrf.mxu2 }
 0x2a8   :  { %v757_v52 = vadd.f32 %v756_v35, %v644_v39 }
 0x2aa   :  { %v806_v51 = vmax.f32 %v757_v52, 0.0 }
 0x2af   :  { %v759_v60 = vpop.f32.mrf.mxu2 }
 0x2b0   :  { %v760_v47 = vadd.f32 %v759_v60, %v647_v54 }
 0x2b2   :  { %v807_v7 = vmax.f32 %v760_v47, 0.0 }
 0x2b4   :  { %850 = vmatpush.msra.mxu3 %v807_v7 }
 0x2b6   :  { %851 = vmatpush.msra.mxu3 %v806_v51 }
 0x2b8   :  { %852 = vmatpush.msra.mxu3 %v805_v27 }
 0x2ba   :  { %853 = vmatpush.msra.mxu3 %v804_v15 }
 0x2bc   :  { %854 = vmatpush.msra.mxu3 %v803_v23 }
 0x2be   :  { %855 = vmatpush.msra.mxu3 %v802_v24 }
 0x2c0   :  { %856 = vmatpush.msra.mxu3 %v801_v17 }
 0x2c2   :  { %857 = vmatpush.msra.mxu3 %v800_v19 }
 0x2c4   :  { %858 = vmatpush.msra.mxu3 %v799_v12 }
 0x2c5   :  { %859 = vmatmul.f32.vlgmr.msra.gmra.mxu3 %v820_v38 }
 0x30e   :  { %v840_v2 = vpop.f32.mrf.mxu3 }
 0x30f   :  { %v841_v20 = vadd.f32 %v840_v2, %v817_v8 }
 0x348   :  { %v860_v63 = vpop.f32.mrf.mxu3 }
 0x349   :  { %v861_v36 = vadd.f32 %v860_v63, %v841_v20 }
 0x34b   :  { %863 = vst [vmem:[%s1613_s6] sm:$0x1] %v861_v36 }

</bundles_post_ra>
